<compile_context>
chip_gen: v5e
topology: v5e:2x2
jax: 0.10.0
libtpu: 0.0.40
codegen_flags: <defaults>
</compile_context>

<pallas_src>
import jax
import jax.numpy as jnp
from jax.experimental import pallas as pl
from jax.experimental.pallas import tpu as pltpu

LANE = 128
SUBLANE = 8


def _round_up(n, m):
    return ((n + m - 1) // m) * m


def _linear_hardsigmoid_kernel(x_ref, w_ref, b_ref, o_ref):
    # x_ref: (tm, IN), w_ref: (IN, OUT_pad), b_ref: (1, OUT_pad),
    # o_ref: (tm, OUT_pad). W/b already carry the folded hardsigmoid affine,
    # so the epilogue is a single clip.
    y = jnp.dot(x_ref[...], w_ref[...], preferred_element_type=jnp.float32)
    y = y + b_ref[...]                      # broadcast (1, OUT_pad)
    o_ref[...] = jnp.clip(y, 0.0, 1.0).astype(o_ref.dtype)


def prepare_params(w, b):
    """One-time parameter transform (call once at init, NOT per forward).

    * folds hardsigmoid: clamp(y+3,0,6)/6 == clip(y*(1/6)+0.5, 0, 1)
      -> W' = W/6, b' = b/6 + 0.5
    * pads OUT (10 -> 128) so the kernel's output store is lane-dense.
      K (=100) is intentionally left unpadded.
    """
    IN, OUT = w.shape
    out_pad = _round_up(OUT, LANE)
    wp = jnp.pad(w * (1.0 / 6.0), ((0, 0), (0, out_pad - OUT)))
    bp = jnp.pad(b * (1.0 / 6.0) + 0.5, (0, out_pad - OUT)).reshape(1, out_pad)
    return wp, bp


def _pick_tm(batch, tm_max):
    """Batch tile: full-extent block for tiny batches, multiple of 8 otherwise,
    capped so the grid has >= 2 steps (v7x dual TensorCore) and <= tm_max rows
    (v6e roofline / VMEM headroom)."""
    if batch <= SUBLANE:
        return batch                       # single full-extent block, no padding
    b8 = _round_up(batch, SUBLANE)
    tm = min(tm_max, b8)
    half = _round_up(pl.cdiv(b8, 2), SUBLANE)   # ensures >= 2 grid steps
    return max(SUBLANE, min(tm, half))


def linear_hardsigmoid(x, wp, bp, out_features, *, tm_max=1024):
    """x: (B, IN) f32; wp/bp: outputs of prepare_params. Returns (B, out_features)."""
    B, IN = x.shape
    in_w, out_pad = wp.shape
    assert in_w == IN, (in_w, IN)

    tm = _pick_tm(B, tm_max)
    grid = (pl.cdiv(B, tm),)

    out_padded = pl.pallas_call(
        _linear_hardsigmoid_kernel,
        out_shape=jax.ShapeDtypeStruct((B, out_pad), x.dtype),
        grid=grid,
        in_specs=[
            # x: K is full-extent (100), no HBM padding / extra traffic.
            pl.BlockSpec((tm, IN), lambda i: (i, 0)),
            # Weight/bias blocks are constant across the M grid -> resident in
            # VMEM; single-buffered since re-fetch never happens.
            pl.BlockSpec((in_w, out_pad), lambda i: (0, 0),
                         pipeline_mode=pl.Buffered(1)),
            pl.BlockSpec((1, out_pad), lambda i: (0, 0),
                         pipeline_mode=pl.Buffered(1)),
        ],
        out_specs=pl.BlockSpec((tm, out_pad), lambda i: (i, 0)),
        compiler_params=pltpu.CompilerParams(
            dimension_semantics=("parallel",),
        ),
    )(x, wp, bp)

    return out_padded[:, :out_features]


if __name__ == "__main__":
    key = jax.random.PRNGKey(0)
    kx, kw, kb, kx2 = jax.random.split(key, 4)

    # Shapes implied by the PyTorch module: x1 = randn(1, 100), Linear(100, 10).
    B, IN, OUT = 1, 100, 10
    x = jax.random.normal(kx, (B, IN), dtype=jnp.float32)

    # Deterministic Linear(100, 10) init (PyTorch-style uniform bound 1/sqrt(IN)).
    bound = 1.0 / jnp.sqrt(jnp.float32(IN))
    w = jax.random.uniform(kw, (IN, OUT), dtype=jnp.float32,
                           minval=-bound, maxval=bound)
    b = jax.random.uniform(kb, (OUT,), dtype=jnp.float32,
                           minval=-bound, maxval=bound)

    # One-time parameter preparation (pad + fold hardsigmoid affine).
    wp, bp = prepare_params(w, b)

    def ref_fn(xv):
        return jnp.clip(xv @ w + b + 3.0, 0.0, 6.0) / 6.0

    # Module-native shape (1, 100).
    out = linear_hardsigmoid(x, wp, bp, OUT)
    jax.block_until_ready(out)
    assert out.shape == (B, OUT)
    assert jnp.allclose(out, ref_fn(x), atol=1e-5, rtol=1e-5)

    # Small ragged batch exercises the cdiv grid + partial last tile path.
    B2 = 13
    x2 = jax.random.normal(kx2, (B2, IN), dtype=jnp.float32)
    out2 = linear_hardsigmoid(x2, wp, bp, OUT)
    jax.block_until_ready(out2)
    assert out2.shape == (B2, OUT)
    assert jnp.allclose(out2, ref_fn(x2), atol=1e-5, rtol=1e-5)

    print("KERNEL_OK")
</pallas_src>

<mosaic_0001>
module attributes {stable_mosaic.version = 11 : i64} {
  func.func @_linear_hardsigmoid_kernel(%arg0: i32, %arg1: memref<1x100xf32, #tpu.memory_space<vmem>>, %arg2: memref<100x128xf32, #tpu.memory_space<vmem>>, %arg3: memref<1x128xf32, #tpu.memory_space<vmem>>, %arg4: memref<1x128xf32, #tpu.memory_space<vmem>>) attributes {dimension_semantics = [#tpu.dimension_semantics<parallel>], iteration_bounds = array<i64: 1>, scalar_prefetch = 0 : i64, scratch_operands = 0 : i64, tpu.core_type = #tpu.core_type<tc>, window_params = [{transform_indices = @transform_0, window_bounds = array<i64: 1, 100>}, {pipeline_mode = #tpu.pipeline_mode<synchronous>, transform_indices = @transform_1, window_bounds = array<i64: 100, 128>}, {pipeline_mode = #tpu.pipeline_mode<synchronous>, transform_indices = @transform_2, window_bounds = array<i64: 1, 128>}, {transform_indices = @transform_3, window_bounds = array<i64: 1, 128>}]} {
    %c0 = arith.constant 0 : index
    %c0_0 = arith.constant 0 : index
    %0 = vector.load %arg1[%c0, %c0_0] : memref<1x100xf32, #tpu.memory_space<vmem>>, vector<1x100xf32>
    %c0_1 = arith.constant 0 : index
    %c0_2 = arith.constant 0 : index
    %1 = vector.load %arg2[%c0_1, %c0_2] : memref<100x128xf32, #tpu.memory_space<vmem>>, vector<100x128xf32>
    %cst = arith.constant dense<0.000000e+00> : vector<1x128xf32>
    %2 = tpu.matmul %0, %1, %cst {dimension_numbers = #tpu.dot_dimension_numbers<[1], [0], [0], [1], [0, 0, 1, 1], [], []>} : vector<1x100xf32>, vector<100x128xf32>, vector<1x128xf32> -> vector<1x128xf32>
    %c0_3 = arith.constant 0 : index
    %c0_4 = arith.constant 0 : index
    %3 = vector.load %arg3[%c0_3, %c0_4] : memref<1x128xf32, #tpu.memory_space<vmem>>, vector<1x128xf32>
    %4 = arith.addf %2, %3 : vector<1x128xf32>
    %cst_5 = arith.constant 0.000000e+00 : f32
    %cst_6 = arith.constant 1.000000e+00 : f32
    %5 = vector.broadcast %cst_5 : f32 to vector<1x128xf32>
    %6 = arith.maximumf %5, %4 : vector<1x128xf32>
    %7 = vector.broadcast %cst_6 : f32 to vector<1x128xf32>
    %8 = arith.minimumf %7, %6 : vector<1x128xf32>
    %c0_7 = arith.constant 0 : index
    %c0_8 = arith.constant 0 : index
    %9 = vector.load %arg4[%c0_7, %c0_8] : memref<1x128xf32, #tpu.memory_space<vmem>>, vector<1x128xf32>
    tpu.vector_store %arg4[%c0_7, %c0_8], %8 {strides = array<i32>} : memref<1x128xf32, #tpu.memory_space<vmem>>, vector<1x128xf32>,
    return
  }
  func.func @transform_0(%arg0: i32) -> (i32, i32) {
    %c0_i32 = arith.constant 0 : i32
    %c0_i32_0 = arith.constant 0 : i32
    return %arg0, %c0_i32 : i32, i32
  }
  func.func @transform_1(%arg0: i32) -> (i32, i32) {
    %c0_i32 = arith.constant 0 : i32
    %c0_i32_0 = arith.constant 0 : i32
    %c0_i32_1 = arith.constant 0 : i32
    return %c0_i32, %c0_i32_0 : i32, i32
  }
  func.func @transform_2(%arg0: i32) -> (i32, i32) {
    %c0_i32 = arith.constant 0 : i32
    %c0_i32_0 = arith.constant 0 : i32
    %c0_i32_1 = arith.constant 0 : i32
    return %c0_i32, %c0_i32_0 : i32, i32
  }
  func.func @transform_3(%arg0: i32) -> (i32, i32) {
    %c0_i32 = arith.constant 0 : i32
    %c0_i32_0 = arith.constant 0 : i32
    return %arg0, %c0_i32 : i32, i32
  }
}

</mosaic_0001>

<bundles_post_ra>
// kernel: tpu_custom_call.1
= control target key start
LH: loop header
LB: loop body
LE: loop exit
PB: predicated region body
PF: predicated region fallthrough
CT: control target
= control target key end

     0   :  { %8 = vsyncpa [#allocation3], 0  ;;  %s231_s0 = inlined_call_operand.hbm [shape: f32[1,100], index: 0, kind: input, shape index: {}]   ;;  %s232_s1 = inlined_call_operand.hbm [shape: f32[100,128], index: 1, kind: input, shape index: {}]   ;;  %s233_s2 = inlined_call_operand.vmem [shape: f32[1,128], index: 2, kind: input, shape index: {}]   ;;  %s234_s3 = inlined_call_operand.hbm [shape: f32[1,128], index: 3, kind: output, shape index: {}]  }
   0x1   :  { %9 = vsyncpa [#allocation6], 0 }
   0x2   :  { %10 = vsyncpa [#allocation4], 0  ;;  %s16_s14 = sshll.u32 %s231_s0, 4  ;;  %s194_s15 = smov [#allocation2]   ;;  %s17_s14 = int_to_ptr.hbm [resolvable:$true] %s16_s14 }
   0x3   :  { %s18_s16 = sshll.u32 %s194_s15, 4  ;;  %s26_s19 = sshll.u32 %s232_s1, 4  ;;  %s19_s16 = int_to_ptr.vmem [resolvable:$true] %s18_s16  ;;  %s27_s19 = int_to_ptr.hbm [resolvable:$true] %s26_s19 }
   0x4   :  { %21 = dma.hbm_to_vmem [thread:$0]  %s17_s14, 16, %s19_s16, [#allocation3]  }
   0x5   :  { %s195_s20 = smov [#allocation5]   ;;  %s196_s22 = smov 128  }
   0x6   :  { %s28_s21 = sshll.u32 %s195_s20, 4  ;;  %s197_s23 = smov 8   ;;  %s29_s21 = int_to_ptr.vmem [resolvable:$true] %s28_s21 }
   0x7   :  { %34 = dma.hbm_to_vmem [thread:$0]  %s27_s19, 1664, %s29_s21, [#allocation6], %s196_s22, %s196_s22, %s197_s23  }
   0x8   :  { %188 = dma.done.wait [#allocation3], 16  }
   0x9   :  { %189 = vsyncadd [#allocation3], 4294967280 }
   0xa   :  { %190 = dma.done.wait [#allocation6], 1664  }
   0xb   :  { %191 = vsyncadd [#allocation6], 4294965632  ;;  %vm64_vm0 = vcmask 1043456   ;;  %v58_v0 = vld [vmem:[#allocation5 + $0x60] sm:$0xf]  ;;  %v57_v1 = vld [vmem:[#allocation5 + $0x58] sm:$0xff] }
   0xc   :  { %109 = vmatpush.msk.msra.mxu0 %vm64_vm0, %v58_v0  ;;  %v56_v2 = vld [vmem:[#allocation5 + $0x50] sm:$0xff]  ;;  %v55_v3 = vld [vmem:[#allocation5 + $0x48] sm:$0xff]  ;;  %v54_v4 = vld [vmem:[#allocation5 + $0x40] sm:$0xff]  ;;  %vm60_vm1 = vcmask 818176   ;;  %s198_s24 = smov [#allocation7]   ;;  %s98_s28 = sshll.u32 %s234_s3, 4  ;;  %s99_s28 = int_to_ptr.hbm [resolvable:$true] %s98_s28 }
   0xd   :  { %v53_v5 = vld [vmem:[#allocation5 + $0x38] sm:$0xff]  ;;  %v52_v6 = vld [vmem:[#allocation5 + $0x30] sm:$0xff]  ;;  %v51_v7 = vld [vmem:[#allocation5 + $0x28] sm:$0xff]  ;;  %s96_s25 = sshll.u32 %s198_s24, 4  ;;  %s97_s25 = int_to_ptr.vmem [resolvable:$true] %s96_s25 }
   0xe   :  { %72 = vmatpush.msra.mxu0 %v57_v1  ;;  %v50_v8 = vld [vmem:[#allocation5 + $0x20] sm:$0xff]  ;;  %v49_v9 = vld [vmem:[#allocation5 + $0x18] sm:$0xff]  ;;  %v48_v10 = vld [vmem:[#allocation5 + $0x10] sm:$0xff] }
   0xf   :  { %v47_v11 = vld [vmem:[#allocation5 + $0x8] sm:$0xff]  ;;  %v46_v12 = vld [vmem:[#allocation5] sm:$0xff]  ;;  %v45_v13 = vld [vmem:[#allocation2] sm:$0x1] }
  0x10   :  { %73 = vmatpush.msra.mxu0 %v56_v2  ;;  %v59_v14 = vld [vmem:[%s233_s2] sm:$0x1] }
  0x12   :  { %74 = vmatpush.msra.mxu0 %v55_v3 }
  0x14   :  { %75 = vmatpush.msra.mxu0 %v54_v4 }
  0x16   :  { %76 = vmatpush.msra.mxu0 %v53_v5 }
  0x18   :  { %77 = vmatpush.msra.mxu0 %v52_v6 }
  0x1a   :  { %78 = vmatpush.msra.mxu0 %v51_v7 }
  0x1c   :  { %79 = vmatpush.msra.mxu0 %v50_v8 }
  0x1e   :  { %80 = vmatpush.msra.mxu0 %v49_v9 }
  0x20   :  { %81 = vmatpush.msra.mxu0 %v48_v10 }
  0x22   :  { %82 = vmatpush.msra.mxu0 %v47_v11 }
  0x24   :  { %83 = vmatpush.msra.mxu0 %v46_v12 }
  0x25   :  { %110 = vmatmul.msk.f32.vlgmr.msra.gmra.mxu0 %vm60_vm1, %v45_v13 }
  0xa2   :  { %v85_v15 = vpop.f32.mrf.mxu0 }
  0xa3   :  { %v86_v16 = vadd.f32 %v85_v15, %v59_v14 }
  0xa5   :  { %v88_v17 = vmax.f32 %v86_v16, 0.0 }
  0xa7   :  { %v89_v18 = vmin.f32 %v88_v17, 1.0 }
  0xa9   :  { %90 = vst [vmem:[#allocation7] sm:$0x1] %v89_v18 }
  0xaa   :  { %101 = dma.vmem_to_hbm [thread:$0]  %s97_s25, 16, %s99_s28, [#allocation4]  }
  0xab   :  { %192 = dma.done.wait [#allocation4], 16  }
  0xac   :  { %193 = vsyncadd [#allocation4], 4294967280 }
  0xad   :  { %106 = vsyncpa [#allocation3], 1 }
  0xae   :  { %107 = vsyncpa [#allocation6], 1 }
  0xaf   :  { %108 = vsyncpa [#allocation4], 1 }

</bundles_post_ra>
